<compile_context>
chip_gen: v6e
topology: v6e:2x2x1
jax: 0.10.0
libtpu: 0.0.40
codegen_flags: <defaults>
</compile_context>

<pallas_src>
import functools

import jax
import jax.numpy as jnp
from jax.experimental import pallas as pl
from jax.experimental.pallas import tpu as pltpu


def _focal_loss_kernel(logits_ref, tgt_ref, part_ref, *, gamma, alpha, n_rows,
                       tile_n, transposed):
    i = pl.program_id(0)
    x = logits_ref[...].astype(jnp.float32)             # (tile_n, C)
    t = tgt_ref[...]                                     # (1, tile_n) or (tile_n, 1)

    if transposed:
        # (C, tile_n): batch rows on the 128-lane axis, classes on sublanes.
        # XLU transpose of a narrow (<128) class axis is cheap and sits on a
        # different unit than the VPU/EUP work it unblocks.
        xw = jnp.transpose(x, (1, 0))
        red = 0
        cls = jax.lax.broadcasted_iota(jnp.int32, xw.shape, 0)
        rows = jax.lax.broadcasted_iota(jnp.int32, (1, tile_n), 1) + i * tile_n
    else:
        xw = x                                            # (tile_n, C), C >= 128
        red = 1
        cls = jax.lax.broadcasted_iota(jnp.int32, xw.shape, 1)
        rows = jax.lax.broadcasted_iota(jnp.int32, (tile_n, 1), 0) + i * tile_n

    # Numerically stable softmax cross entropy per example.
    m = jnp.max(xw, axis=red, keepdims=True)
    z = xw - m
    ez = jnp.exp(z)
    sum_ez = jnp.sum(ez, axis=red, keepdims=True)         # >= 1, never zero
    lse = jnp.log(sum_ez)

    # Target logit / target prob via select (no one-hot cast+mul, no per-row exp).
    # TODO(synk): torch.nn.functional.cross_entropy raises on out-of-range
    # target indices; here they silently yield tgt_z = tgt_ez = 0 (ce = lse).
    onehot = cls == t
    tgt_z = jnp.sum(jnp.where(onehot, z, 0.0), axis=red, keepdims=True)
    tgt_ez = jnp.sum(jnp.where(onehot, ez, 0.0), axis=red, keepdims=True)

    ce = lse - tgt_z                                       # per-row CE (reduction='none')
    pt = tgt_ez / sum_ez                                   # == exp(-ce), reuses exp(z)
    w = 1.0 - pt

    g = float(gamma)
    if g == round(g) and 1.0 <= g <= 8.0:                  # integer gamma: VALU multiplies
        wpow = w
        for _ in range(int(round(g)) - 1):
            wpow = wpow * w
    elif g == 0.0:
        wpow = jnp.ones_like(w)
    else:                                                  # non-integer gamma fallback
        wpow = jnp.power(jnp.maximum(w, 0.0), g)

    focal = wpow * ce * jnp.float32(alpha)
    # Select-mask the ragged/OOB tail rows (NOT multiplicative masking: garbage
    # rows can hold NaN/Inf and must not propagate).
    focal = jnp.where(rows < n_rows, focal, 0.0)

    if transposed:
        # focal is (1, tile_n) with tile_n % 128 == 0: fold into per-lane
        # partials with static, 128-aligned lane slices + a VALU add tree.
        chunks = [focal[:, k * 128:(k + 1) * 128] for k in range(tile_n // 128)]
        while len(chunks) > 1:
            nxt = [chunks[j] + chunks[j + 1] for j in range(0, len(chunks) - 1, 2)]
            if len(chunks) % 2:
                nxt.append(chunks[-1])
            chunks = nxt
        part_ref[...] = chunks[0]                          # (1, 128) lane partials
    else:
        # focal is (tile_n, 1): reduce to a scalar and spread it over the 128
        # output lanes pre-divided by 128 so the wrapper epilogue is uniform.
        s = jnp.sum(focal)
        part_ref[...] = jnp.broadcast_to(s * jnp.float32(1.0 / 128.0), (1, 128))


def _round_up(x, m):
    return -(-x // m) * m


def _vmem_capacity_bytes():
    try:
        cap = int(getattr(pltpu.get_tpu_info(), "vmem_capacity_bytes"))
        if cap > 0:
            return cap
    except Exception:
        pass
    return 64 * 1024 * 1024   # conservative default: v7x physical VMEM


def _choose_tile_n(n, c, itemsize, transposed):
    """Byte-driven, generation-aware row tile (always a multiple of 128)."""
    cap = _vmem_capacity_bytes()
    vmem_limit = min((cap * 3) // 4, 100 * 1024 * 1024)    # ~48 MiB v7x, ~96 MiB v5e/v6e
    budget = max(vmem_limit - 4 * 1024 * 1024, 8 * 1024 * 1024)

    n_pad = _round_up(max(n, 1), 128)

    # Aim for ~4 MiB of raw logits per grid step (per-step overhead ~0.35 us;
    # multi-MiB blocks reach ~85%+ of the HBM roofline).
    target_bytes = 4 * 1024 * 1024
    rows_target = max(128, (target_bytes // (c * itemsize)) // 128 * 128)

    # VMEM plan per row: double-buffered input block + ~6 f32-sized live
    # intermediates (widened x, transpose, z, exp(z), selects, iota), plus the
    # lane-padded (tile_n, 1) int32 targets buffers in the C>=128 path.
    per_row = c * (2 * itemsize + 6 * 4)
    if not transposed:
        per_row += 2 * 128 * 4
    rows_vmem = max(128, (budget // per_row) // 128 * 128)

    tile = min(rows_target, rows_vmem, n_pad)
    # Guarantee >= 2 grid steps whenever possible: pipelining everywhere and
    # dual-TensorCore sharding of the "parallel" axis on v7x.
    if n_pad >= 256:
        tile = min(tile, max(128, _round_up(n_pad, 256) // 2))
    return max(tile, 128), int(vmem_limit)


def focal_loss(logits, targets, gamma=2.0, alpha=1.0):
    """Pallas TPU FocalLoss.forward: logits (N, C) any float dtype, targets (N,) ints."""
    n, c = logits.shape
    itemsize = jnp.dtype(logits.dtype).itemsize
    transposed = c < 128                        # small C -> lane-dense transposed layout
    tile_n, vmem_limit = _choose_tile_n(n, c, itemsize, transposed)
    num_tiles = pl.cdiv(n, tile_n)

    if transposed:
        tgt2d = targets.astype(jnp.int32).reshape(1, n)
        tgt_spec = pl.BlockSpec((1, tile_n), lambda i: (0, i))
    else:
        tgt2d = targets.astype(jnp.int32).reshape(n, 1)
        tgt_spec = pl.BlockSpec((tile_n, 1), lambda i: (i, 0))

    kernel = functools.partial(
        _focal_loss_kernel, gamma=float(gamma), alpha=float(alpha), n_rows=n,
        tile_n=tile_n, transposed=transposed)

    partials = pl.pallas_call(
        kernel,
        out_shape=jax.ShapeDtypeStruct((1, num_tiles * 128), jnp.float32),
        grid=(num_tiles,),
        in_specs=[
            pl.BlockSpec((tile_n, c), lambda i: (i, 0)),   # logits row tile (bf16 ok)
            tgt_spec,                                      # matching targets tile
        ],
        out_specs=pl.BlockSpec((1, 128), lambda i: (0, i)),
        compiler_params=pltpu.CompilerParams(
            dimension_semantics=("parallel",),             # independent per-tile partials
            vmem_limit_bytes=vmem_limit,
        ),
    )(logits, tgt2d)

    # Every tile wrote lane partials (or a pre-divided broadcast), so the
    # epilogue is a plain dense sum -- no strided [:,0] gather.
    return jnp.sum(partials) / jnp.float32(n)


def _focal_loss_ref(logits, targets, gamma=2.0, alpha=1.0):
    # Pure-JAX reference matching torch.nn.functional.cross_entropy semantics.
    logp = jax.nn.log_softmax(logits.astype(jnp.float32), axis=-1)
    ce = -jnp.take_along_axis(logp, targets[:, None].astype(jnp.int32), axis=-1)[:, 0]
    pt = jnp.exp(-ce)
    return jnp.mean((1.0 - pt) ** gamma * ce * alpha)


if __name__ == "__main__":
    key = jax.random.PRNGKey(0)
    k1, k2, k3, k4 = jax.random.split(key, 4)

    # Case 1: small class count (C=16) -> transposed lane-dense path.
    #         N=1000 -> forced 2-tile grid (512-row tiles) with masked ragged tail.
    n1, c1 = 1000, 16
    logits1 = 3.0 * jax.random.normal(k1, (n1, c1), dtype=jnp.float32)
    targets1 = jax.random.randint(k2, (n1,), 0, c1, dtype=jnp.int32)
    out1 = jax.block_until_ready(focal_loss(logits1, targets1, gamma=2.0, alpha=1.0))
    ref1 = _focal_loss_ref(logits1, targets1, gamma=2.0, alpha=1.0)
    assert jnp.allclose(out1, ref1, rtol=1e-4, atol=1e-5), (out1, ref1)

    # Case 2: bf16 logits passed straight through (no wrapper-side f32 copy).
    out2 = jax.block_until_ready(
        focal_loss(logits1.astype(jnp.bfloat16), targets1, gamma=2.0, alpha=1.0))
    ref2 = _focal_loss_ref(logits1.astype(jnp.bfloat16), targets1, gamma=2.0, alpha=1.0)
    assert jnp.allclose(out2, ref2, rtol=1e-4, atol=1e-5), (out2, ref2)

    # Case 3: wide class count (C=256, already lane dense) -> untransposed path,
    #         N=600 -> 2 tiles of 384 rows, masked tail, (tile_n,1) targets DMA.
    n3, c3 = 600, 256
    logits3 = jax.random.normal(k3, (n3, c3), dtype=jnp.float32)
    targets3 = jax.random.randint(k4, (n3,), 0, c3, dtype=jnp.int32)
    out3 = jax.block_until_ready(focal_loss(logits3, targets3, gamma=2.0, alpha=1.0))
    ref3 = _focal_loss_ref(logits3, targets3, gamma=2.0, alpha=1.0)
    assert jnp.allclose(out3, ref3, rtol=1e-4, atol=1e-5), (out3, ref3)

    print("KERNEL_OK")
</pallas_src>

<mosaic_0001>
module attributes {stable_mosaic.version = 11 : i64} {
  func.func @_focal_loss_kernel(%arg0: i32, %arg1: memref<512x16xf32, #tpu.memory_space<vmem>>, %arg2: memref<1x512xi32, #tpu.memory_space<vmem>>, %arg3: memref<1x128xf32, #tpu.memory_space<vmem>>) attributes {dimension_semantics = [#tpu.dimension_semantics<parallel>], iteration_bounds = array<i64: 2>, scalar_prefetch = 0 : i64, scratch_operands = 0 : i64, tpu.core_type = #tpu.core_type<tc>, window_params = [{transform_indices = @transform_0, window_bounds = array<i64: 512, 16>}, {transform_indices = @transform_1, window_bounds = array<i64: 1, 512>}, {transform_indices = @transform_2, window_bounds = array<i64: 1, 128>}]} {
    %c0 = arith.constant 0 : index
    %c0_0 = arith.constant 0 : index
    %0 = vector.load %arg1[%c0, %c0_0] : memref<512x16xf32, #tpu.memory_space<vmem>>, vector<512x16xf32>
    %c0_1 = arith.constant 0 : index
    %c0_2 = arith.constant 0 : index
    %1 = vector.load %arg2[%c0_1, %c0_2] : memref<1x512xi32, #tpu.memory_space<vmem>>, vector<1x512xi32>
    %2 = tpu.transpose %0, [1, 0] : vector<512x16xf32> -> vector<16x512xf32>
    %3 = tpu.iota {dimensions = array<i32: 0>} : vector<16x512xi32>
    %4 = tpu.iota {dimensions = array<i32: 1>} : vector<1x512xi32>
    %c512_i32 = arith.constant 512 : i32
    %5 = arith.muli %arg0, %c512_i32 : i32
    %6 = vector.broadcast %5 : i32 to vector<1x512xi32>
    %7 = arith.addi %4, %6 : vector<1x512xi32>
    %cst = arith.constant dense<0xFF800000> : vector<512xf32>
    %8 = vector.multi_reduction <maximumf>, %2, %cst [0] : vector<16x512xf32> to vector<512xf32>
    %9 = vector.shape_cast %8 : vector<512xf32> to vector<1x512xf32>
    %10 = vector.broadcast %9 : vector<1x512xf32> to vector<16x512xf32>
    %11 = arith.subf %2, %10 : vector<16x512xf32>
    %12 = math.exp %11 : vector<16x512xf32>
    %cst_3 = arith.constant dense<0.000000e+00> : vector<512xf32>
    %13 = vector.multi_reduction <add>, %12, %cst_3 [0] : vector<16x512xf32> to vector<512xf32>
    %14 = vector.shape_cast %13 : vector<512xf32> to vector<1x512xf32>
    %15 = math.log %14 : vector<1x512xf32>
    %16 = vector.broadcast %1 : vector<1x512xi32> to vector<16x512xi32>
    %17 = arith.cmpi eq, %3, %16 : vector<16x512xi32>
    %cst_4 = arith.constant 0.000000e+00 : f32
    %18 = vector.broadcast %cst_4 : f32 to vector<16x512xf32>
    %19 = arith.select %17, %11, %18 : vector<16x512xi1>, vector<16x512xf32>
    %cst_5 = arith.constant dense<0.000000e+00> : vector<512xf32>
    %20 = vector.multi_reduction <add>, %19, %cst_5 [0] : vector<16x512xf32> to vector<512xf32>
    %21 = vector.shape_cast %20 : vector<512xf32> to vector<1x512xf32>
    %cst_6 = arith.constant 0.000000e+00 : f32
    %22 = vector.broadcast %cst_6 : f32 to vector<16x512xf32>
    %23 = arith.select %17, %12, %22 : vector<16x512xi1>, vector<16x512xf32>
    %cst_7 = arith.constant dense<0.000000e+00> : vector<512xf32>
    %24 = vector.multi_reduction <add>, %23, %cst_7 [0] : vector<16x512xf32> to vector<512xf32>
    %25 = vector.shape_cast %24 : vector<512xf32> to vector<1x512xf32>
    %26 = arith.subf %15, %21 : vector<1x512xf32>
    %27 = arith.divf %25, %14 : vector<1x512xf32>
    %cst_8 = arith.constant 1.000000e+00 : f32
    %28 = vector.broadcast %cst_8 : f32 to vector<1x512xf32>
    %29 = arith.subf %28, %27 : vector<1x512xf32>
    %30 = arith.mulf %29, %29 : vector<1x512xf32>
    %31 = arith.mulf %30, %26 : vector<1x512xf32>
    %cst_9 = arith.constant 1.000000e+00 : f32
    %32 = vector.broadcast %cst_9 : f32 to vector<1x512xf32>
    %33 = arith.mulf %31, %32 : vector<1x512xf32>
    %c1000_i32 = arith.constant 1000 : i32
    %34 = vector.broadcast %c1000_i32 : i32 to vector<1x512xi32>
    %35 = arith.cmpi slt, %7, %34 : vector<1x512xi32>
    %cst_10 = arith.constant 0.000000e+00 : f32
    %36 = vector.broadcast %cst_10 : f32 to vector<1x512xf32>
    %37 = arith.select %35, %33, %36 : vector<1x512xi1>, vector<1x512xf32>
    %38 = vector.extract_strided_slice %37 {offsets = [0, 0], sizes = [1, 128], strides = [1, 1]} : vector<1x512xf32> to vector<1x128xf32>
    %39 = vector.extract_strided_slice %37 {offsets = [0, 128], sizes = [1, 128], strides = [1, 1]} : vector<1x512xf32> to vector<1x128xf32>
    %40 = vector.extract_strided_slice %37 {offsets = [0, 256], sizes = [1, 128], strides = [1, 1]} : vector<1x512xf32> to vector<1x128xf32>
    %41 = vector.extract_strided_slice %37 {offsets = [0, 384], sizes = [1, 128], strides = [1, 1]} : vector<1x512xf32> to vector<1x128xf32>
    %42 = arith.addf %38, %39 : vector<1x128xf32>
    %43 = arith.addf %40, %41 : vector<1x128xf32>
    %44 = arith.addf %42, %43 : vector<1x128xf32>
    %c0_11 = arith.constant 0 : index
    %c0_12 = arith.constant 0 : index
    %45 = vector.load %arg3[%c0_11, %c0_12] : memref<1x128xf32, #tpu.memory_space<vmem>>, vector<1x128xf32>
    tpu.vector_store %arg3[%c0_11, %c0_12], %44 {strides = array<i32>} : memref<1x128xf32, #tpu.memory_space<vmem>>, vector<1x128xf32>,
    return
  }
  func.func @transform_0(%arg0: i32) -> (i32, i32) {
    %c0_i32 = arith.constant 0 : i32
    %c0_i32_0 = arith.constant 0 : i32
    return %arg0, %c0_i32 : i32, i32
  }
  func.func @transform_1(%arg0: i32) -> (i32, i32) {
    %c0_i32 = arith.constant 0 : i32
    %c0_i32_0 = arith.constant 0 : i32
    return %c0_i32, %arg0 : i32, i32
  }
  func.func @transform_2(%arg0: i32) -> (i32, i32) {
    %c0_i32 = arith.constant 0 : i32
    %c0_i32_0 = arith.constant 0 : i32
    return %c0_i32, %arg0 : i32, i32
  }
}

</mosaic_0001>

<bundles_post_ra>
// kernel: tpu_custom_call.1
= control target key start
LH: loop header
LB: loop body
LE: loop exit
PB: predicated region body
PF: predicated region fallthrough
CT: control target
= control target key end

     0   :  { %7 = vsyncpa [#allocation3], 0  ;;  %s1086_s0 = inlined_call_operand.vmem [shape: f32[1000,16], index: 0, kind: input, shape index: {}]   ;;  %s1087_s1 = inlined_call_operand.vmem [shape: s32[1,1000], index: 1, kind: input, shape index: {}]   ;;  %s1088_s2 = inlined_call_operand.hbm [shape: f32[1,256], index: 2, kind: output, shape index: {}]  }
   0x1   :  { %9 = vsyncpa [#allocation3 + $0x1], 0  ;;  %s846_s9 = smov 0   ;;  %s848_s10 = smov 0  }
   0x2   :  { %s850_s11 = smov 0   ;;  %s852_s12 = smov 0  }
   0x3 LB: > { %s867_s13 = sadd.s32 4294967295, %s828_s12   ;;  %s686_s14 = sadd.s32 4294967294, %s828_s12   ;;  %s828_s12 = sphi %s852_s12, %s1094_s12   ;;  %s824_s11 = sphi %s850_s11, %s1093_s11   ;;  %s820_s10 = sphi %s848_s10, %s1092_s10   ;;  %s816_s9 = sphi %s846_s9, %s1091_s9  }
   0x4   : > { %s871_s15 = sadd.s32 1, %s828_s12   ;;  %s74_s16 = sadd.s32 1, %s824_s11 }
   0x5   : > { %s71_s17 = ssub.s32 %s828_s12, %s871_s15  ;;  %p84_p0 = scmp.ne.s32.totalorder %s824_s11, %s820_s10 }
   0x6   : > { %p72_p1 = scmp.eq.s32.totalorder %s71_s17, 0  ;;  %p85_p2 = scmp.eq.s32.totalorder %s867_s13, 1 }
   0x7   : > { %p90_p3 = scmp.ne.s32.totalorder %s820_s10, %s816_s9  ;;  %p91_p4 = scmp.eq.s32.totalorder %s686_s14, 1 }
   0x8   : > { %s882_s18 = scalar_select %p72_p1, %s824_s11, %s74_s16  }
   0x9   : > { %p884_p5 = por %p85_p2, %p84_p0  ;;  %p888_p6 = por %p91_p4, %p90_p3 }
   0xa   : > { %p689_p7 = scmp.ge.s32.totalorder %s828_s12, 1  ;;  %p134_p8 = scmp.lt.s32.totalorder %s828_s12, 3 }
   0xc   : > { %p135_p9 = pnand %p689_p7, %p134_p8 }
   0xd   : > { %s690_s21 = sshll.u32 (!%p135_p9), %s867_s13, 6  ;;  %s692_s26 = sshll.u32 (!%p135_p9), %s867_s13, 2 }
   0xe   : > { %138 = sbr.rel (%p135_p9) target bundleno = 306 (0x132), region = 28  ;;  %p168_p10 = scmp.lt.s32.totalorder (!%p135_p9), %s690_s21, 124 }
   0xf   : > { %p178_p11 = scmp.lt.s32.totalorder (!%p135_p9), %s692_s26, 7  ;;  %s693_s30 = sshll.u32 (!%p135_p9), %s867_s13, 9 }
  0x10   : > { %s161_s3 = sand.u32 (!%p135_p9), 1, %s820_s10   ;;  %s694_s4 = sshll.u32 (!%p135_p9), %s867_s13, 4 }
  0x11   : > { %s162_s5 = scalar_lea.vmem (!%p135_p9), [#allocation2], %s161_s3  ;;  %s620_s14 = scalar_lea.hbm (!%p135_p9), %s1088_s2, %s694_s4 }
  0x12   : > { %s622_s6 = sshll.u32 (!%p135_p9), %s162_s5, 4  ;;  %s610_s16 = scalar_lea.sflag (!%p135_p9), [#allocation3], %s161_s3  ;;  %s623_s6 = int_to_ptr.vmem [resolvable:$true] %s622_s6 }
  0x13   : > { %s1096_s21 = smov (!%p168_p10, %s690_s21), 124  ;;  %s1098_s26 = smov (!%p178_p11, %s692_s26), 7 }
  0x14   : > { %s691_s22 = sshll.u32 %s1096_s21, 3  ;;  %s180_s29 = scalar_lea.vmem %s1087_s1, %s1098_s26 }
  0x15   : > { %s898_s25 = scalar_lea.vmem %s1086_s0, %s691_s22  ;;  %s768_s17 = scalar_lea.vmem %s623_s6, 16 }
  0x16   : > { %v198_v0 = vld [vmem:[%s898_s25 + $0x80] sm:$0xff]  ;;  %v199_v2 = vld [vmem:[%s898_s25 + $0x88] sm:$0xff]  ;;  %v200_v4 = vld [vmem:[%s898_s25 + $0x90] sm:$0xff]  ;;  %p769_p12 = scmp.ne.s32.totalorder %s623_s6, %s768_s17  ;;  %s830_s21 = smov [#allocation2]  }
  0x17   : > { %v182_v1 = vld [vmem:[%s898_s25] sm:$0xff]  ;;  %279 = vxpose.xlu1.b32.start [1/16] (narrow) %v198_v0, 16  ;;  %v183_v3 = vld [vmem:[%s898_s25 + $0x8] sm:$0xff]  ;;  %v184_v5 = vld [vmem:[%s898_s25 + $0x10] sm:$0xff]  ;;  %s772_s22 = sshll.u32 %s830_s21, 4  ;;  %s773_s22 = int_to_ptr.vmem [resolvable:$false] %s772_s22 }
  0x18   : > { %247 = vxpose.xlu0.b32.start [1/16] (narrow) %v182_v1, 16  ;;  %v201_v6 = vld [vmem:[%s898_s25 + $0x98] sm:$0xff]  ;;  %v202_v8 = vld [vmem:[%s898_s25 + $0xa0] sm:$0xff]  ;;  %v203_v10 = vld [vmem:[%s898_s25 + $0xa8] sm:$0xff]  ;;  %p770_p13 = pnand %p769_p12, %p884_p5  ;;  %s774_s13 = scalar_lea.vmem %s773_s22, 32 }
  0x19   : > { %v185_v7 = vld [vmem:[%s898_s25 + $0x18] sm:$0xff]  ;;  %v186_v9 = vld [vmem:[%s898_s25 + $0x20] sm:$0xff]  ;;  %v187_v11 = vld [vmem:[%s898_s25 + $0x28] sm:$0xff]  ;;  %p775_p1 = scmp.lt.s32.totalorder %s623_s6, %s773_s22  ;;  %p776_p2 = scmp.lt.s32.totalorder %s774_s13, %s768_s17 }
  0x1a   : > { %v204_v12 = vld [vmem:[%s898_s25 + $0xb0] sm:$0xff]  ;;  %v205_v14 = vld [vmem:[%s898_s25 + $0xb8] sm:$0xff]  ;;  %v206_v16 = vld [vmem:[%s898_s25 + $0xc0] sm:$0xff]  ;;  %p771_p0 = pneg %p770_p13 }
  0x1b   : > { %280 = vxpose.xlu1.b32.cont [2/16] (narrow) %v199_v2, 16  ;;  %v188_v13 = vld [vmem:[%s898_s25 + $0x30] sm:$0xff]  ;;  %v189_v15 = vld [vmem:[%s898_s25 + $0x38] sm:$0xff]  ;;  %v190_v17 = vld [vmem:[%s898_s25 + $0x40] sm:$0xff]  ;;  %p777_p3 = por %p776_p2, %p775_p1 }
  0x1c   : > { %248 = vxpose.xlu0.b32.cont [2/16] (narrow) %v183_v3, 16  ;;  %v207_v18 = vld [vmem:[%s898_s25 + $0xc8] sm:$0xff]  ;;  %v208_v20 = vld [vmem:[%s898_s25 + $0xd0] sm:$0xff]  ;;  %v209_v22 = vld [vmem:[%s898_s25 + $0xd8] sm:$0xff] }
  0x1d   : > { %v191_v19 = vld [vmem:[%s898_s25 + $0x48] sm:$0xff]  ;;  %v192_v21 = vld [vmem:[%s898_s25 + $0x50] sm:$0xff]  ;;  %v193_v23 = vld [vmem:[%s898_s25 + $0x58] sm:$0xff]  ;;  %p778_p4 = pnand %p777_p3, %p771_p0 }
  0x1e   : > { %v210_v24 = vld [vmem:[%s898_s25 + $0xe0] sm:$0xff]  ;;  %v211_v26 = vld [vmem:[%s898_s25 + $0xe8] sm:$0xff]  ;;  %v212_v28 = vld [vmem:[%s898_s25 + $0xf0] sm:$0xff] }
  0x1f   : > { %281 = vxpose.xlu1.b32.cont [3/16] (narrow) %v200_v4, 16  ;;  %v194_v25 = vld [vmem:[%s898_s25 + $0x60] sm:$0xff]  ;;  %v195_v27 = vld [vmem:[%s898_s25 + $0x68] sm:$0xff]  ;;  %v196_v29 = vld [vmem:[%s898_s25 + $0x70] sm:$0xff] }
  0x20   : > { %249 = vxpose.xlu0.b32.cont [3/16] (narrow) %v184_v5, 16  ;;  %v213_v30 = vld [vmem:[%s898_s25 + $0xf8] sm:$0xff]  ;;  %v230_v32 = vld [vmem:[%s898_s25 + $0x180] sm:$0xff]  ;;  %v231_v34 = vld [vmem:[%s898_s25 + $0x188] sm:$0xff] }
  0x21   : > { %v197_v31 = vld [vmem:[%s898_s25 + $0x78] sm:$0xff]  ;;  %v214_v33 = vld [vmem:[%s898_s25 + $0x100] sm:$0xff]  ;;  %v215_v35 = vld [vmem:[%s898_s25 + $0x108] sm:$0xff] }
  0x22   : > { %v232_v36 = vld [vmem:[%s898_s25 + $0x190] sm:$0xff]  ;;  %v233_v38 = vld [vmem:[%s898_s25 + $0x198] sm:$0xff]  ;;  %v234_v40 = vld [vmem:[%s898_s25 + $0x1a0] sm:$0xff] }
  0x23   : > { %282 = vxpose.xlu1.b32.cont [4/16] (narrow) %v201_v6, 16  ;;  %v216_v37 = vld [vmem:[%s898_s25 + $0x110] sm:$0xff]  ;;  %v217_v39 = vld [vmem:[%s898_s25 + $0x118] sm:$0xff]  ;;  %v218_v41 = vld [vmem:[%s898_s25 + $0x120] sm:$0xff] }
  0x24   : > { %250 = vxpose.xlu0.b32.cont [4/16] (narrow) %v185_v7, 16  ;;  %v235_v42 = vld [vmem:[%s898_s25 + $0x1a8] sm:$0xff]  ;;  %v236_v44 = vld [vmem:[%s898_s25 + $0x1b0] sm:$0xff]  ;;  %v237_v46 = vld [vmem:[%s898_s25 + $0x1b8] sm:$0xff] }
  0x25   : > { %v219_v43 = vld [vmem:[%s898_s25 + $0x128] sm:$0xff]  ;;  %v220_v45 = vld [vmem:[%s898_s25 + $0x130] sm:$0xff]  ;;  %v221_v47 = vld [vmem:[%s898_s25 + $0x138] sm:$0xff] }
  0x26   : > { %v238_v48 = vld [vmem:[%s898_s25 + $0x1c0] sm:$0xff]  ;;  %v239_v50 = vld [vmem:[%s898_s25 + $0x1c8] sm:$0xff]  ;;  %v240_v52 = vld [vmem:[%s898_s25 + $0x1d0] sm:$0xff] }
  0x27   : > { %283 = vxpose.xlu1.b32.cont [5/16] (narrow) %v202_v8, 16  ;;  %v222_v49 = vld [vmem:[%s898_s25 + $0x140] sm:$0xff]  ;;  %v223_v51 = vld [vmem:[%s898_s25 + $0x148] sm:$0xff]  ;;  %v224_v53 = vld [vmem:[%s898_s25 + $0x150] sm:$0xff] }
  0x28   : > { %251 = vxpose.xlu0.b32.cont [5/16] (narrow) %v186_v9, 16  ;;  %v241_v54 = vld [vmem:[%s898_s25 + $0x1d8] sm:$0xff]  ;;  %v242_v56 = vld [vmem:[%s898_s25 + $0x1e0] sm:$0xff]  ;;  %v243_v58 = vld [vmem:[%s898_s25 + $0x1e8] sm:$0xff] }
  0x29   : > { %v225_v55 = vld [vmem:[%s898_s25 + $0x158] sm:$0xff]  ;;  %v226_v57 = vld [vmem:[%s898_s25 + $0x160] sm:$0xff]  ;;  %v227_v59 = vld [vmem:[%s898_s25 + $0x168] sm:$0xff] }
  0x2a   : > { %v244_v60 = vld [vmem:[%s898_s25 + $0x1f0] sm:$0xff]  ;;  %v245_v62 = vld [vmem:[%s898_s25 + $0x1f8] sm:$0xff] }
  0x2b   : > { %284 = vxpose.xlu1.b32.cont [6/16] (narrow) %v203_v10, 16  ;;  %v228_v61 = vld [vmem:[%s898_s25 + $0x170] sm:$0xff]  ;;  %v229_v63 = vld [vmem:[%s898_s25 + $0x178] sm:$0xff] }
  0x2c   : > { %252 = vxpose.xlu0.b32.cont [6/16] (narrow) %v187_v11, 16 }
  0x2f   : > { %285 = vxpose.xlu1.b32.cont [7/16] (narrow) %v204_v12, 16 }
  0x30   : > { %253 = vxpose.xlu0.b32.cont [7/16] (narrow) %v188_v13, 16 }
  0x33   : > { %286 = vxpose.xlu1.b32.cont [8/16] (narrow) %v205_v14, 16 }
  0x34   : > { %254 = vxpose.xlu0.b32.cont [8/16] (narrow) %v189_v15, 16 }
  0x37   : > { %287 = vxpose.xlu1.b32.cont [9/16] (narrow) %v206_v16, 16 }
  0x38   : > { %255 = vxpose.xlu0.b32.cont [9/16] (narrow) %v190_v17, 16 }
  0x3b   : > { %288 = vxpose.xlu1.b32.cont [10/16] (narrow) %v207_v18, 16 }
  0x3c   : > { %256 = vxpose.xlu0.b32.cont [10/16] (narrow) %v191_v19, 16 }
  0x3f   : > { %289 = vxpose.xlu1.b32.cont [11/16] (narrow) %v208_v20, 16 }
  0x40   : > { %257 = vxpose.xlu0.b32.cont [11/16] (narrow) %v192_v21, 16 }
  0x43   : > { %290 = vxpose.xlu1.b32.cont [12/16] (narrow) %v209_v22, 16 }
  0x44   : > { %258 = vxpose.xlu0.b32.cont [12/16] (narrow) %v193_v23, 16 }
  0x47   : > { %291 = vxpose.xlu1.b32.cont [13/16] (narrow) %v210_v24, 16 }
  0x48   : > { %259 = vxpose.xlu0.b32.cont [13/16] (narrow) %v194_v25, 16 }
  0x4b   : > { %292 = vxpose.xlu1.b32.cont [14/16] (narrow) %v211_v26, 16 }
  0x4c   : > { %260 = vxpose.xlu0.b32.cont [14/16] (narrow) %v195_v27, 16 }
  0x4f   : > { %293 = vxpose.xlu1.b32.cont [15/16] (narrow) %v212_v28, 16 }
  0x50   : > { %261 = vxpose.xlu0.b32.cont [15/16] (narrow) %v196_v29, 16 }
  0x53   : > { %294 = vxpose.xlu1.b32.end [16/16] (narrow) %v213_v30, 16 }
  0x54   : > { %262 = vxpose.xlu0.b32.end [16/16] (narrow) %v197_v31, 16 }
  0x57   : > { %343 = vxpose.xlu1.b32.start [1/16] (narrow) %v230_v32, 16 }
  0x58   : > { %311 = vxpose.xlu0.b32.start [1/16] (narrow) %v214_v33, 16  ;;  %v375_v33 = vlaneseq }
  0x5b   : > { %344 = vxpose.xlu1.b32.cont [2/16] (narrow) %v231_v34, 16 }
  0x5c   : > { %312 = vxpose.xlu0.b32.cont [2/16] (narrow) %v215_v35, 16 }
  0x5f   : > { %345 = vxpose.xlu1.b32.cont [3/16] (narrow) %v232_v36, 16 }
  0x60   : > { %313 = vxpose.xlu0.b32.cont [3/16] (narrow) %v216_v37, 16 }
  0x63   : > { %346 = vxpose.xlu1.b32.cont [4/16] (narrow) %v233_v38, 16 }
  0x64   : > { %314 = vxpose.xlu0.b32.cont [4/16] (narrow) %v217_v39, 16 }
  0x67   : > { %347 = vxpose.xlu1.b32.cont [5/16] (narrow) %v234_v40, 16 }
  0x68   : > { %315 = vxpose.xlu0.b32.cont [5/16] (narrow) %v218_v41, 16  ;;  %v978_v41 = vshrl.u32 %v375_v33, 7 }
  0x6b   : > { %348 = vxpose.xlu1.b32.cont [6/16] (narrow) %v235_v42, 16 }
  0x6c   : > { %316 = vxpose.xlu0.b32.cont [6/16] (narrow) %v219_v43, 16 }
  0x6f   : > { %349 = vxpose.xlu1.b32.cont [7/16] (narrow) %v236_v44, 16 }
  0x70   : > { %317 = vxpose.xlu0.b32.cont [7/16] (narrow) %v220_v45, 16 }
  0x73   : > { %350 = vxpose.xlu1.b32.cont [8/16] (narrow) %v237_v46, 16 }
  0x74   : > { %318 = vxpose.xlu0.b32.cont [8/16] (narrow) %v221_v47, 16 }
  0x77   : > { %351 = vxpose.xlu1.b32.cont [9/16] (narrow) %v238_v48, 16  ;;  %v483_v48 = vsub.s32 1, %v978_v41 }
  0x78   : > { %319 = vxpose.xlu0.b32.cont [9/16] (narrow) %v222_v49, 16 }
  0x7b   : > { %352 = vxpose.xlu1.b32.cont [10/16] (narrow) %v239_v50, 16  ;;  %v479_v50 = vsub.s32 0, %v978_v41 }
  0x7c   : > { %320 = vxpose.xlu0.b32.cont [10/16] (narrow) %v223_v51, 16  ;;  %v246_v51 = vld [vmem:[%s180_s29] sm:$0xf] }
  0x7f   : > { %353 = vxpose.xlu1.b32.cont [11/16] (narrow) %v240_v52, 16 }
  0x80   : > { %321 = vxpose.xlu0.b32.cont [11/16] (narrow) %v224_v53, 16 }
  0x83   : > { %354 = vxpose.xlu1.b32.cont [12/16] (narrow) %v241_v54, 16 }
  0x84   : > { %322 = vxpose.xlu0.b32.cont [12/16] (narrow) %v225_v55, 16 }
  0x87   : > { %355 = vxpose.xlu1.b32.cont [13/16] (narrow) %v242_v56, 16 }
  0x88   : > { %323 = vxpose.xlu0.b32.cont [13/16] (narrow) %v226_v57, 16  ;;  %v986_v57 = vadd.s32 8, %v978_v41 }
  0x8b   : > { %356 = vxpose.xlu1.b32.cont [14/16] (narrow) %v243_v58, 16  ;;  %v484_v58 = vrot.slane %v246_v51, %v483_v48 }
  0x8c   : > { %324 = vxpose.xlu0.b32.cont [14/16] (narrow) %v227_v59, 16 }
  0x8d   : > { %vm494_vm0 = vcmp.eq.s32.totalorder %v978_v41, %v484_v58  ;;  %vm498_vm1 = vcmp.eq.s32.totalorder %v986_v57, %v484_v58 }
  0x8f   : > { %357 = vxpose.xlu1.b32.cont [15/16] (narrow) %v244_v60, 16  ;;  %v480_v60 = vrot.slane %v246_v51, %v479_v50 }
  0x90   : > { %325 = vxpose.xlu0.b32.cont [15/16] (narrow) %v228_v61, 16 }
  0x91   : > { %vm493_vm2 = vcmp.eq.s32.totalorder %v978_v41, %v480_v60  ;;  %vm497_vm3 = vcmp.eq.s32.totalorder %v986_v57, %v480_v60 }
  0x93   : > { %358 = vxpose.xlu1.b32.end [16/16] (narrow) %v245_v62, 16  ;;  %v295_v0 = vpop.trf.xlu1 }
  0x94   : > { %326 = vxpose.xlu0.b32.end [16/16] (narrow) %v229_v63, 16  ;;  %v263_v1 = vpop.trf.xlu0 }
  0x97   : > { %v296_v2 = vpop.trf.xlu1 }
  0x98   : > { %v396_v3 = vmax.f32 %v295_v0, %v296_v2  ;;  %v264_v4 = vpop.trf.xlu0 }
  0x99   : > { %v389_v5 = vmax.f32 %v263_v1, %v264_v4 }
  0x9a   : > { %v397_v6 = vrot.slane %v396_v3, 4 }
  0x9b   : > { %v390_v7 = vrot.slane %v389_v5, 4 }
  0x9c   : > { %v398_v8 = vmax.f32 %v396_v3, %v397_v6 }
  0x9d   : > { %v391_v9 = vmax.f32 %v389_v5, %v390_v7 }
  0x9e   : > { %v399_v10 = vrot.slane %v398_v8, 2 }
  0x9f   : > { %v392_v11 = vrot.slane %v391_v9, 2 }
  0xa0   : > { %v400_v12 = vmax.f32 %v398_v8, %v399_v10 }
  0xa1   : > { %v393_v13 = vmax.f32 %v391_v9, %v392_v11 }
  0xa2   : > { %v401_v14 = vrot.slane %v400_v12, 1 }
  0xa3   : > { %v394_v15 = vrot.slane %v393_v13, 1 }
  0xa4   : > { %v402_v16 = vmax.f32 %v400_v12, %v401_v14  ;;  %v491_v12 = vsub.s32 3, %v978_v41 }
  0xa5   : > { %v395_v17 = vmax.f32 %v393_v13, %v394_v15 }
  0xa6   : > { %v964_v18 = vsub.f32 %v295_v0, %v402_v16  ;;  %v966_v19 = vsub.f32 %v296_v2, %v402_v16 }
  0xa7   : > { %v968_v20 = vsub.f32 %v263_v1, %v395_v17  ;;  %v971_v22 = vsub.f32 %v264_v4, %v395_v17  ;;  %v487_v17 = vsub.s32 2, %v978_v41 }
  0xa8   : > { %v427_v21 = vmul.f32 1.442695, %v964_v18  ;;  %v435_v23 = vmul.f32 1.442695, %v966_v19 }
  0xa9   : > { %v425_v24 = vmul.f32 1.442695, %v968_v20  ;;  %v433_v25 = vmul.f32 1.442695, %v971_v22 }
  0xaa   : > { %736 = vpow2.f32 %v427_v21  ;;  %v492_v21 = vrot.slane %v246_v51, %v491_v12 }
  0xab   : > { %738 = vpow2.f32 %v435_v23 }
  0xac   : > { %740 = vpow2.f32 %v425_v24  ;;  %v502_v24 = vsel %vm494_vm0, %v964_v18, 0.0  ;;  %vm496_vm4 = vcmp.eq.s32.totalorder %v978_v41, %v492_v21  ;;  %vm500_vm5 = vcmp.eq.s32.totalorder %v986_v57, %v492_v21 }
  0xad   : > { %742 = vpow2.f32 %v433_v25  ;;  %v506_v25 = vsel %vm498_vm1, %v966_v19, 0.0 }
  0xb7   : > { %v737_v32 = vpop.eup %736 }
  0xb8   : > { %v739_v34 = vpop.eup %738  ;;  %v538_v7 = vsel %vm494_vm0, %v737_v32, 0.0 }
  0xb9   : > { %v741_v37 = vpop.eup %740  ;;  %v448_v42 = vadd.f32 %v739_v34, %v737_v32  ;;  %v542_v9 = vsel %vm498_vm1, %v739_v34, 0.0  ;;  %v516_v32 = vadd.f32 %v506_v25, %v502_v24 }
  0xba   : > { %v743_v40 = vpop.eup %742  ;;  %v537_v10 = vsel %vm493_vm2, %v741_v37, 0.0  ;;  %v552_v14 = vadd.f32 %v542_v9, %v538_v7 }
  0xbb   : > { %v441_v45 = vadd.f32 %v743_v40, %v741_v37  ;;  %v449_v49 = vrot.slane %v448_v42, 4  ;;  %v541_v11 = vsel %vm497_vm3, %v743_v40, 0.0 }
  0xbc   : > { %v545_v15 = vadd.f32 %v541_v11, %v537_v10 }
  0xbd   : > { %v442_v54 = vrot.slane %v441_v45, 4  ;;  %v450_v59 = vadd.f32 %v449_v49, %v448_v42 }
  0xbf   : > { %v443_v1 = vadd.f32 %v442_v54, %v441_v45  ;;  %v451_v6 = vrot.slane %v450_v59, 2 }
  0xc1   : > { %v444_v8 = vrot.slane %v443_v1, 2  ;;  %v452_v13 = vadd.f32 %v451_v6, %v450_v59 }
  0xc3   : > { %v445_v16 = vadd.f32 %v444_v8, %v443_v1  ;;  %v453_v23 = vrot.slane %v452_v13, 1 }
  0xd3   : > { %v359_v26 = vpop.trf.xlu1 }
  0xd4   : > { %v327_v27 = vpop.trf.xlu0 }
  0xd7   : > { %v360_v28 = vpop.trf.xlu1 }
  0xd8   : > { %v328_v29 = vpop.trf.xlu0  ;;  %v410_v30 = vmax.f32 %v359_v26, %v360_v28 }
  0xd9   : > { %v403_v31 = vmax.f32 %v327_v27, %v328_v29 }
  0xda   : > { %v411_v35 = vrot.slane %v410_v30, 4 }
  0xdb   : > { %v404_v36 = vrot.slane %v403_v31, 4 }
  0xdc   : > { %v412_v38 = vmax.f32 %v410_v30, %v411_v35  ;;  %v446_v30 = vrot.slane %v445_v16, 1  ;;  %v454_v35 = vadd.f32 %v453_v23, %v452_v13 }
  0xdd   : > { %v405_v39 = vmax.f32 %v403_v31, %v404_v36  ;;  %v488_v31 = vrot.slane %v246_v51, %v487_v17 }
  0xde   : > { %v413_v43 = vrot.slane %v412_v38, 2 }
  0xdf   : > { %v406_v44 = vrot.slane %v405_v39, 2  ;;  %vm495_vm6 = vcmp.eq.s32.totalorder %v978_v41, %v488_v31  ;;  %vm499_vm7 = vcmp.eq.s32.totalorder %v986_v57, %v488_v31 }
  0xe0   : > { %v414_v46 = vmax.f32 %v412_v38, %v413_v43  ;;  %v517_v43 = vrot.slane %v516_v32, 4 }
  0xe1   : > { %v407_v47 = vmax.f32 %v405_v39, %v406_v44 }
  0xe2   : > { %v415_v52 = vrot.slane %v414_v46, 1 }
  0xe3   : > { %v408_v53 = vrot.slane %v407_v47, 1 }
  0xe4   : > { %v416_v55 = vmax.f32 %v414_v46, %v415_v52 }
  0xe5   : > { %v409_v56 = vmax.f32 %v407_v47, %v408_v53 }
  0xe6   : > { %v988_v61 = vsub.f32 %v359_v26, %v416_v55  ;;  %v990_v62 = vsub.f32 %v360_v28, %v416_v55  ;;  %v501_v26 = vsel %vm493_vm2, %v968_v20, 0.0  ;;  %v553_v28 = vrot.slane %v552_v14, 4 }
  0xe7   : > { %v992_v63 = vsub.f32 %v327_v27, %v409_v56  ;;  %v994_v0 = vsub.f32 %v328_v29, %v409_v56  ;;  %v505_v27 = vsel %vm497_vm3, %v971_v22, 0.0  ;;  %v546_v29 = vrot.slane %v545_v15, 4 }
  0xe8   : > { %v431_v2 = vmul.f32 1.442695, %v988_v61  ;;  %v439_v3 = vmul.f32 1.442695, %v990_v62  ;;  %v509_v34 = vadd.f32 %v505_v27, %v501_v26  ;;  %v554_v19 = vadd.f32 %v553_v28, %v552_v14 }
  0xe9   : > { %v429_v4 = vmul.f32 1.442695, %v992_v63  ;;  %v437_v5 = vmul.f32 1.442695, %v994_v0  ;;  %v547_v37 = vadd.f32 %v546_v29, %v545_v15  ;;  %v447_v20 = vadd.f32 %v446_v30, %v445_v16 }
  0xea   : > { %744 = vpow2.f32 %v431_v2  ;;  %v510_v44 = vrot.slane %v509_v34, 4  ;;  %v555_v49 = vrot.slane %v554_v19, 2  ;;  %v504_v53 = vsel %vm496_vm4, %v988_v61, 0.0 }
  0xeb   : > { %746 = vpow2.f32 %v439_v3  ;;  %v548_v50 = vrot.slane %v547_v37, 2  ;;  %v508_v54 = vsel %vm500_vm5, %v990_v62, 0.0  ;;  %v518_v56 = vadd.f32 %v517_v43, %v516_v32 }
  0xec   : > { %748 = vpow2.f32 %v429_v4  ;;  %v511_v58 = vadd.f32 %v510_v44, %v509_v34  ;;  %v503_v2 = vsel %vm495_vm6, %v992_v63, 0.0  ;;  %v507_v3 = vsel %vm499_vm7, %v994_v0, 0.0 }
  0xed   : > { %750 = vpow2.f32 %v437_v5  ;;  %v556_v4 = vadd.f32 %v555_v49, %v554_v19  ;;  %v530_v61 = vadd.f32 %v508_v54, %v504_v53  ;;  %v549_v6 = vadd.f32 %v548_v50, %v547_v37 }
  0xee   : > { %752 = vrcp.f32 %v454_v35  ;;  %v523_v8 = vadd.f32 %v507_v3, %v503_v2  ;;  %v519_v10 = vrot.slane %v518_v56, 2  ;;  %v512_v13 = vrot.slane %v511_v58, 2 }
  0xef   : > { %754 = vrcp.f32 %v447_v20  ;;  %v531_v41 = vrot.slane %v530_v61, 4  ;;  %v557_v14 = vrot.slane %v556_v4, 1  ;;  %v550_v15 = vrot.slane %v549_v6, 1 }
  0xf0   : > { %756 = vlog2.f32 %v454_v35  ;;  %v524_v16 = vrot.slane %v523_v8, 4  ;;  %v520_v23 = vadd.f32 %v519_v10, %v518_v56  ;;  %v513_v25 = vadd.f32 %v512_v13, %v511_v58 }
  0xf1   : > { %758 = vlog2.f32 %v447_v20  ;;  %v532_v26 = vadd.f32 %v531_v41, %v530_v61  ;;  %v558_v29 = vadd.f32 %v557_v14, %v556_v4  ;;  %v551_v30 = vadd.f32 %v550_v15, %v549_v6 }
  0xf2   : > { %v525_v31 = vadd.f32 %v524_v16, %v523_v8  ;;  %v521_v34 = vrot.slane %v520_v23, 1  ;;  %v514_v35 = vrot.slane %v513_v25, 1 }
  0xf4   : > { %v515_v43 = vadd.f32 %v514_v35, %v513_v25 }
  0xf7   : > { %v745_v18 = vpop.eup %744 }
  0xf8   : > { %v747_v36 = vpop.eup %746  ;;  %v540_v22 = vsel %vm496_vm4, %v745_v18, 0.0 }
  0xf9   : > { %v749_v38 = vpop.eup %748  ;;  %v462_v39 = vadd.f32 %v747_v36, %v745_v18  ;;  %v544_v40 = vsel %vm500_vm5, %v747_v36, 0.0  ;;  %v533_v18 = vrot.slane %v532_v26, 2 }
  0xfa   : > { %v751_v42 = vpop.eup %750  ;;  %v539_v47 = vsel %vm495_vm6, %v749_v38, 0.0  ;;  %v566_v51 = vadd.f32 %v544_v40, %v540_v22  ;;  %v379_v40 = vand.u32 127, %v375_v33 }
  0xfb   : > { %v463_v45 = vrot.slane %v462_v39, 4  ;;  %v455_v46 = vadd.f32 %v751_v42, %v749_v38  ;;  %v543_v48 = vsel %vm499_vm7, %v751_v42, 0.0  ;;  %v753_v21 = vpop.eup %752  ;;  %v522_v42 = vadd.f32 %v521_v34, %v520_v23 }
  0xfc   : > { %v559_v59 = vadd.f32 %v543_v48, %v539_v47  ;;  %v567_v5 = vrot.slane %v566_v51, 4  ;;  %v755_v28 = vpop.eup %754  ;;  %v580_v20 = vmul.f32 %v753_v21, %v558_v29  ;;  %v534_v44 = vadd.f32 %v533_v18, %v532_v26 }
  0xfd   : > { %v464_v52 = vadd.f32 %v463_v45, %v462_v39  ;;  %v456_v55 = vrot.slane %v455_v46, 4  ;;  %v757_v19 = vpop.eup %756  ;;  %v578_v37 = vmul.f32 %v755_v28, %v551_v30  ;;  %v526_v39 = vrot.slane %v525_v31, 2 }
  0xfe   : > { %v560_v9 = vrot.slane %v559_v59, 4  ;;  %v568_v63 = vadd.f32 %v567_v5, %v566_v51  ;;  %v759_v38 = vpop.eup %758  ;;  %v472_v47 = vmul.f32 0.6931472, %v757_v19  ;;  %v586_v49 = vsub.f32 1.0, %v580_v20 }
  0xff   : > { %v465_v60 = vrot.slane %v464_v52, 2  ;;  %v457_v1 = vadd.f32 %v456_v55, %v455_v46  ;;  %v470_v46 = vmul.f32 0.6931472, %v759_v38  ;;  %v585_v48 = vsub.f32 1.0, %v578_v37 }
 0x100   : > { %v561_v17 = vadd.f32 %v560_v9, %v559_v59  ;;  %v569_v27 = vrot.slane %v568_v63, 2  ;;  %v527_v50 = vadd.f32 %v526_v39, %v525_v31  ;;  %v382_v53 = vadd.s32 384, %v379_v40 }
 0x101   : > { %v466_v62 = vadd.f32 %v465_v60, %v464_v52  ;;  %v458_v7 = vrot.slane %v457_v1, 2  ;;  %v380_v52 = vadd.s32 128, %v379_v40  ;;  %v535_v55 = vrot.slane %v534_v44, 1 }
 0x102   : > { %v562_v32 = vrot.slane %v561_v17, 2  ;;  %v570_v36 = vadd.f32 %v569_v27, %v568_v63  ;;  %v381_v58 = vadd.s32 256, %v379_v40  ;;  %v384_v59 = vstv %s693_s30 }
 0x103   : > { %v467_v11 = vrot.slane %v466_v62, 1  ;;  %v459_v12 = vadd.f32 %v458_v7, %v457_v1  ;;  %v573_v33 = vsub.f32 %v470_v46, %v515_v43  ;;  %v574_v1 = vsub.f32 %v472_v47, %v522_v42 }
 0x104   : > { %v563_v22 = vadd.f32 %v562_v32, %v561_v17  ;;  %v571_v45 = vrot.slane %v570_v36, 1  ;;  %v589_v2 = vmul.f32 %v585_v48, %v585_v48  ;;  %v590_v3 = vmul.f32 %v586_v49, %v586_v49 }
 0x105   : > { %v468_v57 = vadd.f32 %v467_v11, %v466_v62  ;;  %v460_v0 = vrot.slane %v459_v12, 1  ;;  %v528_v5 = vrot.slane %v527_v50, 1  ;;  %v385_v8 = vadd.s32 %v384_v59, %v379_v40 }
 0x106   : > { %v564_v51 = vrot.slane %v563_v22, 1  ;;  %v572_v56 = vadd.f32 %v571_v45, %v570_v36  ;;  %v386_v9 = vadd.s32 %v384_v59, %v380_v52  ;;  %v388_v10 = vadd.s32 %v384_v59, %v382_v53 }
 0x107   : > { %760 = vlog2.f32 %v468_v57  ;;  %v461_v24 = vadd.f32 %v460_v0, %v459_v12  ;;  %v536_v11 = vadd.f32 %v535_v55, %v534_v44  ;;  %v387_v63 = vadd.s32 %v384_v59, %v381_v58 }
 0x108   : > { %762 = vrcp.f32 %v468_v57  ;;  %v565_v6 = vadd.f32 %v564_v51, %v563_v22  ;;  %v593_v14 = vmul.f32 %v589_v2, %v573_v33  ;;  %v594_v15 = vmul.f32 %v590_v3, %v574_v1 }
 0x109   : > { %764 = vlog2.f32 %v461_v24  ;;  %v529_v0 = vadd.f32 %v528_v5, %v527_v50  ;;  %vm597_vm8 = vcmp.lt.s32.totalorder %v385_v8, 1000  ;;  %vm598_vm9 = vcmp.lt.s32.totalorder %v386_v9, 1000 }
 0x10a   : > { %766 = vrcp.f32 %v461_v24  ;;  %vm600_vm10 = vcmp.lt.s32.totalorder %v388_v10, 1000  ;;  %vm599_vm11 = vcmp.lt.s32.totalorder %v387_v63, 1000  ;;  %v601_v26 = vsel %vm597_vm8, %v593_v14, 0.0 }
 0x10b   : > { %v602_v27 = vsel %vm598_vm9, %v594_v15, 0.0 }
 0x10c   : > { %v605_v30 = vadd.f32 %v602_v27, %v601_v26 }
 0x114   : > { %v761_v54 = vpop.eup %760 }
 0x115   : > { %v763_v60 = vpop.eup %762  ;;  %v476_v61 = vmul.f32 0.6931472, %v761_v54 }
 0x116   : > { %v765_v4 = vpop.eup %764  ;;  %v584_v62 = vmul.f32 %v763_v60, %v572_v56 }
 0x117   : > { %v767_v7 = vpop.eup %766  ;;  %v474_v12 = vmul.f32 0.6931472, %v765_v4  ;;  %v576_v57 = vsub.f32 %v476_v61, %v536_v11 }
 0x118   : > { %v582_v13 = vmul.f32 %v767_v7, %v565_v6  ;;  %v588_v41 = vsub.f32 1.0, %v584_v62 }
 0x119   : > { %v575_v21 = vsub.f32 %v474_v12, %v529_v0 }
 0x11a   : > { %v587_v16 = vsub.f32 1.0, %v582_v13  ;;  %v592_v17 = vmul.f32 %v588_v41, %v588_v41 }
 0x11c   : > { %v591_v23 = vmul.f32 %v587_v16, %v587_v16  ;;  %v596_v24 = vmul.f32 %v592_v17, %v576_v57 }
 0x11e   : > { %v595_v25 = vmul.f32 %v591_v23, %v575_v21  ;;  %v604_v28 = vsel %vm600_vm10, %v596_v24, 0.0 }
 0x120   : > { %v603_v29 = vsel %vm599_vm11, %v595_v25, 0.0 }
 0x121   : > { %v606_v31 = vadd.f32 %v604_v28, %v603_v29 }
 0x123   : > { %v607_v32 = vadd.f32 %v606_v31, %v605_v30 }
 0x125   : > { %608 = vst [vmem:[%s162_s5] sm:$0x1] %v607_v32 }
 0x126   : > { %781 = shalt.err (!%p778_p4)
}
 0x127   : > { %s782_s23 = scalar_lea.hbm %s620_s14, 16  ;;  %s786_s26 = scalar_lea.hbm %s1088_s2, 32 }
 0x128   : > { %p783_p7 = scmp.ne.s32.totalorder %s620_s14, %s782_s23  ;;  %p787_p10 = scmp.lt.s32.totalorder %s620_s14, %s1088_s2 }
 0x129   : > { %p788_p11 = scmp.lt.s32.totalorder %s786_s26, %s782_s23 }
 0x12a   : > { %p784_p8 = pnand %p783_p7, %p884_p5 }
 0x12b   : > { %p789_p12 = por %p788_p11, %p787_p10 }
 0x12c   : > { %p785_p9 = pneg %p784_p8 }
 0x12e   : > { %p790_p13 = pnand %p789_p12, %p785_p9 }
 0x130   : > { %793 = shalt.err (!%p790_p13)
}
 0x131   : > { %697 = dma.vmem_to_hbm [thread:$0]  (%p884_p5), %s623_s6, 16, %s620_s14, %s610_s16  }
 0x132 PF: > { %p703_p0 = scmp.ge.s32.totalorder %s828_s12, 2  ;;  %s634_s29 = sand.u32 1, %s816_s9  }
 0x133   : > { %s635_s30 = scalar_lea.sflag [#allocation3], %s634_s29 }
 0x134   : > { %p700_p1 = pnand %p703_p0, %p888_p6 }
 0x136   : > { %p701_p2 = pneg %p700_p1 }
 0x138   : > { %811 = dma.done.wait (%p701_p2), %s635_s30, 16  }
 0x139   : > { %813 = vsyncadd (%p701_p2), %s635_s30, 4294967280  ;;  %p12_p3 = scmp.ge.s32.totalorder %s871_s15, 4   ;;  %s1091_s9 = smov %s820_s10 }
 0x13a   : > { %s1092_s10 = smov %s824_s11  ;;  %s1093_s11 = smov %s882_s18 }
 0x13b   : > { %s1094_s12 = smov %s871_s15  ;;  %14 = sbr.rel (!%p12_p3) target bundleno = 3 (0x3), region = 66 }
 0x140   :  { %639 = vsyncpa [#allocation3], 1 }
 0x141   :  { %641 = vsyncpa [#allocation3 + $0x1], 1 }

</bundles_post_ra>
